<compile_context>
chip_gen: v5e
topology: v5e:2x2
jax: 0.10.0
libtpu: 0.0.40
codegen_flags: <defaults>
</compile_context>

<pallas_src>
import functools

import jax
import jax.numpy as jnp
from jax.experimental import pallas as pl
from jax.experimental.pallas import tpu as pltpu


def _round_up(n, m):
    return ((n + m - 1) // m) * m


def _fixed_hidden_mlp_kernel(x_ref, w2_ref, c_ref, s_ref, o_ref, *,
                             batch, block_rows, tiles_per_core, needs_mask):
    # x_ref : (TM, 20)     streamed batch tile (f32 or bf16)
    # w2_ref: (20, 20)     W.T @ rand_weight, resident (same dtype as x)
    # c_ref : (1, 20)      b @ rand_weight + 1, resident (f32)
    # s_ref : (20, 1)      W.sum(axis=0), resident (f32)
    # o_ref : (1, 8, 128)  per-core resident accumulator block
    step = pl.program_id(1)

    @pl.when(step == 0)
    def _init():
        o_ref[...] = jnp.zeros_like(o_ref)

    # h = relu(X @ W2 + c)  ==  relu((X @ W.T + b) @ rand_weight + 1)
    h = jnp.dot(x_ref[...], w2_ref[...], preferred_element_type=jnp.float32)
    h = jnp.maximum(h + c_ref[...], 0.0)

    # Folded final linear + sum: per-row totals of h @ W.T (bias constant is
    # added in the wrapper).
    row_totals = jnp.dot(h, s_ref[...], preferred_element_type=jnp.float32)  # (TM, 1)

    def accumulate(vals):
        o_ref[...] += jnp.sum(vals)

    if needs_mask:
        core = pl.program_id(0)
        tile_start = (core * tiles_per_core + step) * block_rows
        is_partial = tile_start + block_rows > batch

        @pl.when(is_partial)
        def _masked():  # only tiles containing padded rows pay for the mask
            rows = tile_start + jax.lax.broadcasted_iota(
                jnp.int32, (block_rows, 1), 0)
            accumulate(jnp.where(rows < batch, row_totals, 0.0))

        @pl.when(jnp.logical_not(is_partial))
        def _full():
            accumulate(row_totals)
    else:
        accumulate(row_totals)


def fixed_hidden_mlp(x, w, b, rand_weight, *, block_rows=4096, num_cores=2,
                     matmul_dtype=jnp.float32):
    """x: (B, 20); w: (20, 20); b: (20,); rand_weight: (20, 20) -> scalar f32."""
    batch, dim = x.shape
    x = x.astype(jnp.float32)
    w = w.astype(jnp.float32)
    b = b.astype(jnp.float32)
    r = rand_weight.astype(jnp.float32)

    # Wrapper-side algebraic folds (plain XLA, executed once per call):
    w2 = w.T @ r                                   # fuses the first two matmuls
    c_fold = (b @ r + 1.0).reshape(1, dim)         # fused bias for relu(...)
    s = jnp.sum(w, axis=0).reshape(dim, 1)         # column sums for folded sum
    bias_total = jnp.float32(batch) * jnp.sum(b)   # B * sum(b)

    # Optional low-precision MXU operands (cast once, in the wrapper).
    if matmul_dtype != jnp.float32:
        x = x.astype(matmul_dtype)
        w2 = w2.astype(matmul_dtype)

    # Lane-aligned (TM, 20) batch tiles; sublane alignment 16 for bf16 packing.
    sub = 16 if matmul_dtype == jnp.bfloat16 else 8
    block_rows = _round_up(max(int(block_rows), sub), sub)
    tm = min(block_rows, _round_up(batch, sub))
    num_cores = max(int(num_cores), 1)
    batch_pad = _round_up(batch, tm * num_cores)
    if batch_pad != batch:
        x = jnp.pad(x, ((0, batch_pad - batch), (0, 0)))
    tiles_per_core = batch_pad // (tm * num_cores)

    kernel = functools.partial(
        _fixed_hidden_mlp_kernel,
        batch=batch, block_rows=tm, tiles_per_core=tiles_per_core,
        needs_mask=(batch_pad != batch))

    out = pl.pallas_call(
        kernel,
        out_shape=jax.ShapeDtypeStruct((num_cores, 8, 128), jnp.float32),
        grid=(num_cores, tiles_per_core),
        in_specs=[
            # X tiles stream per grid step; each core owns a contiguous range.
            pl.BlockSpec((tm, dim), lambda cc, i: (cc * tiles_per_core + i, 0)),
            pl.BlockSpec((dim, dim), lambda cc, i: (0, 0)),   # W2 resident
            pl.BlockSpec((1, dim), lambda cc, i: (0, 0)),     # folded bias resident
            pl.BlockSpec((dim, 1), lambda cc, i: (0, 0)),     # column sums resident
        ],
        # Per-core resident accumulator block (constant across the inner axis).
        out_specs=pl.BlockSpec((1, 8, 128), lambda cc, i: (cc, 0, 0)),
        compiler_params=pltpu.CompilerParams(
            dimension_semantics=("parallel", "arbitrary")),
    )(x, w2, c_fold, s)

    return jnp.sum(out[:, 0, 0]) + bias_total


def _reference(x, w, b, rand_weight):
    h = x @ w.T + b
    h = jnp.maximum(h @ rand_weight + 1.0, 0.0)
    h = h @ w.T + b
    return jnp.sum(h)


if __name__ == "__main__":
    key = jax.random.PRNGKey(0)
    k_x, k_w, k_b, k_r, k_x2 = jax.random.split(key, 5)

    batch, dim = 2, 20
    x = jax.random.normal(k_x, (batch, dim), dtype=jnp.float32)

    # nn.Linear(20, 20) params: weight (20, 20), bias (20,)
    bound = 1.0 / jnp.sqrt(jnp.float32(dim))
    w = jax.random.uniform(k_w, (dim, dim), dtype=jnp.float32,
                           minval=-bound, maxval=bound)
    b = jax.random.uniform(k_b, (dim,), dtype=jnp.float32,
                           minval=-bound, maxval=bound)

    # torch.rand((20, 20)) -> uniform [0, 1)
    rand_weight = jax.random.uniform(k_r, (dim, dim), dtype=jnp.float32)

    # 1) Small-batch run (the shape the module implies), f32 path.
    out = fixed_hidden_mlp(x, w, b, rand_weight)
    jax.block_until_ready(out)
    ref = _reference(x, w, b, rand_weight)
    assert jnp.allclose(out, ref, rtol=1e-4, atol=1e-3), (out, ref)

    # 2) Multi-tile grid path (per-core accumulation + masked padded tiles), f32.
    x_big = jax.random.normal(k_x2, (300, dim), dtype=jnp.float32)
    out_big = fixed_hidden_mlp(x_big, w, b, rand_weight, block_rows=64)
    jax.block_until_ready(out_big)
    ref_big = _reference(x_big, w, b, rand_weight)
    assert jnp.allclose(out_big, ref_big, rtol=2e-4, atol=0.1), (out_big, ref_big)

    # 3) Wrapper-side bf16 MXU-operand path (perf option for large batches).
    #    Only sanity-checked for finiteness: bf16 operand rounding makes a tight
    #    scalar-sum comparison seed-dependent.
    out_bf16 = fixed_hidden_mlp(x_big, w, b, rand_weight, block_rows=2048,
                                matmul_dtype=jnp.bfloat16)
    jax.block_until_ready(out_bf16)
    assert bool(jnp.isfinite(out_bf16)), out_bf16

    print("KERNEL_OK")
</pallas_src>

<mosaic_0001>
module attributes {stable_mosaic.version = 11 : i64} {
  func.func @_fixed_hidden_mlp_kernel(%arg0: i32, %arg1: i32, %arg2: memref<8x20xf32, #tpu.memory_space<vmem>>, %arg3: memref<20x20xf32, #tpu.memory_space<vmem>>, %arg4: memref<1x20xf32, #tpu.memory_space<vmem>>, %arg5: memref<20x1xf32, #tpu.memory_space<vmem>>, %arg6: memref<1x8x128xf32, #tpu.memory_space<vmem>>) attributes {dimension_semantics = [#tpu.dimension_semantics<parallel>, #tpu.dimension_semantics<arbitrary>], iteration_bounds = array<i64: 2, 1>, scalar_prefetch = 0 : i64, scratch_operands = 0 : i64, tpu.core_type = #tpu.core_type<tc>, window_params = [{transform_indices = @transform_0, window_bounds = array<i64: 8, 20>}, {pipeline_mode = #tpu.pipeline_mode<synchronous>, transform_indices = @transform_1, window_bounds = array<i64: 20, 20>}, {pipeline_mode = #tpu.pipeline_mode<synchronous>, transform_indices = @transform_2, window_bounds = array<i64: 1, 20>}, {pipeline_mode = #tpu.pipeline_mode<synchronous>, transform_indices = @transform_3, window_bounds = array<i64: 20, 1>}, {transform_indices = @transform_4, window_bounds = array<i64: 1, 8, 128>}]} {
    %c0_i32 = arith.constant 0 : i32
    %0 = arith.cmpi eq, %arg1, %c0_i32 : i32
    %1 = arith.extui %0 : i1 to i32
    %c0_i32_0 = arith.constant 0 : i32
    %2 = arith.cmpi ne, %1, %c0_i32_0 : i32
    scf.if %2 {
      %cst_13 = arith.constant 0.000000e+00 : f32
      %23 = vector.broadcast %cst_13 : f32 to vector<1x8x128xf32>
      %c0_14 = arith.constant 0 : index
      %c0_15 = arith.constant 0 : index
      %c0_16 = arith.constant 0 : index
      %24 = vector.load %arg6[%c0_14, %c0_15, %c0_16] : memref<1x8x128xf32, #tpu.memory_space<vmem>>, vector<1x8x128xf32>
      tpu.vector_store %arg6[%c0_14, %c0_15, %c0_16], %23 {strides = array<i32>} : memref<1x8x128xf32, #tpu.memory_space<vmem>>, vector<1x8x128xf32>,
    } else {
    }
    %c0 = arith.constant 0 : index
    %c0_1 = arith.constant 0 : index
    %3 = vector.load %arg2[%c0, %c0_1] : memref<8x20xf32, #tpu.memory_space<vmem>>, vector<8x20xf32>
    %c0_2 = arith.constant 0 : index
    %c0_3 = arith.constant 0 : index
    %4 = vector.load %arg3[%c0_2, %c0_3] : memref<20x20xf32, #tpu.memory_space<vmem>>, vector<20x20xf32>
    %cst = arith.constant dense<0.000000e+00> : vector<8x20xf32>
    %5 = tpu.matmul %3, %4, %cst {dimension_numbers = #tpu.dot_dimension_numbers<[1], [0], [0], [1], [0, 0, 1, 1], [], []>} : vector<8x20xf32>, vector<20x20xf32>, vector<8x20xf32> -> vector<8x20xf32>
    %c0_4 = arith.constant 0 : index
    %c0_5 = arith.constant 0 : index
    %6 = vector.load %arg4[%c0_4, %c0_5] : memref<1x20xf32, #tpu.memory_space<vmem>>, vector<1x20xf32>
    %7 = vector.broadcast %6 : vector<1x20xf32> to vector<8x20xf32>
    %8 = arith.addf %5, %7 : vector<8x20xf32>
    %cst_6 = arith.constant 0.000000e+00 : f32
    %9 = vector.broadcast %cst_6 : f32 to vector<8x20xf32>
    %10 = arith.maximumf %8, %9 : vector<8x20xf32>
    %c0_7 = arith.constant 0 : index
    %c0_8 = arith.constant 0 : index
    %11 = vector.load %arg5[%c0_7, %c0_8] : memref<20x1xf32, #tpu.memory_space<vmem>>, vector<20x1xf32>
    %cst_9 = arith.constant dense<0.000000e+00> : vector<8x1xf32>
    %12 = tpu.matmul %10, %11, %cst_9 {dimension_numbers = #tpu.dot_dimension_numbers<[1], [0], [0], [1], [0, 0, 1, 1], [], []>} : vector<8x20xf32>, vector<20x1xf32>, vector<8x1xf32> -> vector<8x1xf32>
    %c1_i32 = arith.constant 1 : i32
    %13 = arith.muli %arg0, %c1_i32 : i32
    %14 = arith.addi %13, %arg1 : i32
    %c8_i32 = arith.constant 8 : i32
    %15 = arith.muli %14, %c8_i32 : i32
    %c8_i32_10 = arith.constant 8 : i32
    %16 = arith.addi %15, %c8_i32_10 : i32
    %c2_i32 = arith.constant 2 : i32
    %17 = arith.cmpi sgt, %16, %c2_i32 : i32
    %18 = arith.extui %17 : i1 to i32
    %c0_i32_11 = arith.constant 0 : i32
    %19 = arith.cmpi ne, %18, %c0_i32_11 : i32
    scf.if %19 {
      %23 = tpu.iota {dimensions = array<i32: 0>} : vector<8x1xi32>
      %24 = vector.broadcast %15 : i32 to vector<8x1xi32>
      %25 = arith.addi %24, %23 : vector<8x1xi32>
      %c2_i32_13 = arith.constant 2 : i32
      %26 = vector.broadcast %c2_i32_13 : i32 to vector<8x1xi32>
      %27 = arith.cmpi slt, %25, %26 : vector<8x1xi32>
      %cst_14 = arith.constant 0.000000e+00 : f32
      %28 = vector.broadcast %cst_14 : f32 to vector<8x1xf32>
      %29 = arith.select %27, %12, %28 : vector<8x1xi1>, vector<8x1xf32>
      %c0_15 = arith.constant 0 : index
      %c0_16 = arith.constant 0 : index
      %c0_17 = arith.constant 0 : index
      %30 = vector.load %arg6[%c0_15, %c0_16, %c0_17] : memref<1x8x128xf32, #tpu.memory_space<vmem>>, vector<1x8x128xf32>
      %31 = vector.shape_cast %29 : vector<8x1xf32> to vector<1x8x1xf32>
      %cst_18 = arith.constant dense<0.000000e+00> : vector<1xf32>
      %32 = vector.multi_reduction <add>, %31, %cst_18 [1, 2] : vector<1x8x1xf32> to vector<1xf32>
      %33 = vector.shape_cast %32 : vector<1xf32> to vector<1x1x1xf32>
      %34 = vector.extract %33[0, 0, 0] : f32 from vector<1x1x1xf32>
      %35 = vector.broadcast %34 : f32 to vector<1x8x128xf32>
      %36 = arith.addf %30, %35 : vector<1x8x128xf32>
      %c0_19 = arith.constant 0 : index
      %c0_20 = arith.constant 0 : index
      %c0_21 = arith.constant 0 : index
      %37 = vector.load %arg6[%c0_19, %c0_20, %c0_21] : memref<1x8x128xf32, #tpu.memory_space<vmem>>, vector<1x8x128xf32>
      tpu.vector_store %arg6[%c0_19, %c0_20, %c0_21], %36 {strides = array<i32>} : memref<1x8x128xf32, #tpu.memory_space<vmem>>, vector<1x8x128xf32>,
    } else {
    }
    %true = arith.constant true
    %20 = arith.xori %17, %true : i1
    %21 = arith.extui %20 : i1 to i32
    %c0_i32_12 = arith.constant 0 : i32
    %22 = arith.cmpi ne, %21, %c0_i32_12 : i32
    scf.if %22 {
      %c0_13 = arith.constant 0 : index
      %c0_14 = arith.constant 0 : index
      %c0_15 = arith.constant 0 : index
      %23 = vector.load %arg6[%c0_13, %c0_14, %c0_15] : memref<1x8x128xf32, #tpu.memory_space<vmem>>, vector<1x8x128xf32>
      %24 = vector.shape_cast %12 : vector<8x1xf32> to vector<1x8x1xf32>
      %cst_16 = arith.constant dense<0.000000e+00> : vector<1xf32>
      %25 = vector.multi_reduction <add>, %24, %cst_16 [1, 2] : vector<1x8x1xf32> to vector<1xf32>
      %26 = vector.shape_cast %25 : vector<1xf32> to vector<1x1x1xf32>
      %27 = vector.extract %26[0, 0, 0] : f32 from vector<1x1x1xf32>
      %28 = vector.broadcast %27 : f32 to vector<1x8x128xf32>
      %29 = arith.addf %23, %28 : vector<1x8x128xf32>
      %c0_17 = arith.constant 0 : index
      %c0_18 = arith.constant 0 : index
      %c0_19 = arith.constant 0 : index
      %30 = vector.load %arg6[%c0_17, %c0_18, %c0_19] : memref<1x8x128xf32, #tpu.memory_space<vmem>>, vector<1x8x128xf32>
      tpu.vector_store %arg6[%c0_17, %c0_18, %c0_19], %29 {strides = array<i32>} : memref<1x8x128xf32, #tpu.memory_space<vmem>>, vector<1x8x128xf32>,
    } else {
    }
    return
  }
  func.func @transform_0(%arg0: i32, %arg1: i32) -> (i32, i32) {
    %c1_i32 = arith.constant 1 : i32
    %0 = arith.muli %arg0, %c1_i32 : i32
    %1 = arith.addi %0, %arg1 : i32
    %c0_i32 = arith.constant 0 : i32
    %c0_i32_0 = arith.constant 0 : i32
    return %1, %c0_i32 : i32, i32
  }
  func.func @transform_1(%arg0: i32, %arg1: i32) -> (i32, i32) {
    %c0_i32 = arith.constant 0 : i32
    %c0_i32_0 = arith.constant 0 : i32
    %c0_i32_1 = arith.constant 0 : i32
    return %c0_i32, %c0_i32_0 : i32, i32
  }
  func.func @transform_2(%arg0: i32, %arg1: i32) -> (i32, i32) {
    %c0_i32 = arith.constant 0 : i32
    %c0_i32_0 = arith.constant 0 : i32
    %c0_i32_1 = arith.constant 0 : i32
    return %c0_i32, %c0_i32_0 : i32, i32
  }
  func.func @transform_3(%arg0: i32, %arg1: i32) -> (i32, i32) {
    %c0_i32 = arith.constant 0 : i32
    %c0_i32_0 = arith.constant 0 : i32
    %c0_i32_1 = arith.constant 0 : i32
    return %c0_i32, %c0_i32_0 : i32, i32
  }
  func.func @transform_4(%arg0: i32, %arg1: i32) -> (i32, i32, i32) {
    %c0_i32 = arith.constant 0 : i32
    %c0_i32_0 = arith.constant 0 : i32
    %c0_i32_1 = arith.constant 0 : i32
    return %arg0, %c0_i32, %c0_i32_0 : i32, i32, i32
  }
}

</mosaic_0001>

<bundles_post_ra>
// kernel: tpu_custom_call.1
= control target key start
LH: loop header
LB: loop body
LE: loop exit
PB: predicated region body
PF: predicated region fallthrough
CT: control target
= control target key end

     0   :  { %9 = vsyncpa [#allocation3], 0  ;;  %s826_s0 = inlined_call_operand.hbm [shape: f32[16,20], index: 0, kind: input, shape index: {}]   ;;  %s827_s1 = inlined_call_operand.vmem [shape: f32[20,20], index: 1, kind: input, shape index: {}]   ;;  %s828_s2 = inlined_call_operand.vmem [shape: f32[1,20], index: 2, kind: input, shape index: {}]   ;;  %s829_s3 = inlined_call_operand.vmem [shape: f32[20,1], index: 3, kind: input, shape index: {}]   ;;  %s830_s4 = inlined_call_operand.hbm [shape: f32[2,8,128], index: 4, kind: output, shape index: {}]  }
   0x1   :  { %11 = vsyncpa [#allocation3 + $0x1], 0 }
   0x2   :  { %12 = vsyncpa [#allocation4], 0 }
   0x3   :  { %14 = vsyncpa [#allocation4 + $0x1], 0  ;;  %s672_s15 = smov 0   ;;  %s674_s16 = smov 0  }
   0x4   :  { %s676_s17 = smov 0   ;;  %s678_s18 = smov 0  }
   0x5   :  { %s680_s19 = smov 0   ;;  %s682_s20 = smov 0  }
   0x6 LB: > { %s444_s21 = sadd.s32 4294967295, %s644_s20   ;;  %s445_s22 = sadd.s32 4294967294, %s644_s20   ;;  %s644_s20 = sphi %s682_s20, %s20_s20   ;;  %s640_s19 = sphi %s680_s19, %s839_s19   ;;  %s636_s18 = sphi %s678_s18, %s838_s18   ;;  %s632_s17 = sphi %s676_s17, %s837_s17   ;;  %s628_s16 = sphi %s674_s16, %s836_s16   ;;  %s624_s15 = sphi %s672_s15, %s835_s15  }
   0x7   : > { %s32_s23 = sadd.s32 1, %s640_s19  ;;  %s41_s24 = sadd.s32 1, %s632_s17 }
   0x8   : > { %p34_p0 = scmp.ge.s32.totalorder %s32_s23, 2  ;;  %p48_p1 = scmp.ne.s32.totalorder %s632_s17, %s628_s16 }
   0x9   : > { %p49_p2 = scmp.eq.s32.totalorder %s644_s20, 0  ;;  %p54_p3 = scmp.ne.s32.totalorder %s628_s16, %s624_s15 }
   0xa   : > { %s841_s23 = smov (%p34_p0, %s32_s23), 0  ;;  %p55_p5 = scmp.eq.s32.totalorder %s444_s21, 0 }
   0xb   : > { %p713_p4 = por %p49_p2, %p48_p1  ;;  %s38_s26 = ssub.s32 %s640_s19, %s841_s23 }
   0xc   : > { %p141_p6 = scmp.eq.s32.totalorder %s444_s21, 1  ;;  %p39_p7 = scmp.eq.s32.totalorder %s38_s26, 0 }
   0xd   : > { %p719_p8 = por %p55_p5, %p54_p3  ;;  %p147_p10 = scmp.eq.s32.totalorder %s445_s22, 1 }
   0xe   : > { %p723_p9 = por %p141_p6, %p48_p1  ;;  %p447_p12 = scmp.ge.s32.totalorder %s644_s20, 2 }
   0xf   : > { %s728_s29 = scalar_select %p39_p7, %s632_s17, %s41_s24  }
  0x10   : > { %p730_p11 = por %p147_p10, %p54_p3  ;;  %p480_p13 = scmp.lt.s32.totalorder %s644_s20, 2 }
  0x11   : > { %s176_s5 = sand.u32 1, %s632_s17   ;;  %s449_s7 = sshll.u32 %s640_s19, 3 }
  0x12   : > { %s448_s6 = sshll.u32 %s176_s5, 3  ;;  %s185_s10 = scalar_lea.hbm %s826_s0, %s449_s7 }
  0x13   : > { %s180_s11 = scalar_lea.vmem [#allocation2], %s448_s6  ;;  %s187_s13 = sshll.u32 %s185_s10, 4  ;;  %s188_s13 = int_to_ptr.hbm [resolvable:$true] %s187_s13 }
  0x14   : > { %s189_s12 = sshll.u32 %s180_s11, 4  ;;  %p473_p0 = pnand %p480_p13, %p713_p4  ;;  %s190_s12 = int_to_ptr.vmem [resolvable:$true] %s189_s12 }
  0x15   : > { %p450_p1 = scmp.ge.s32.totalorder %s644_s20, 1  ;;  %p194_p2 = scmp.lt.s32.totalorder %s644_s20, 3 }
  0x16   : > { %s177_s14 = scalar_lea.sflag [#allocation3], %s176_s5 }
  0x17   : > { %475 = dma.hbm_to_vmem [thread:$0]  (!%p473_p0), %s188_s13, 128, %s190_s12, %s177_s14  }
  0x18   : > { %p195_p3 = pnand %p450_p1, %p194_p2 }
  0x19   : > { %s746_s21 = sand.u32 (!%p195_p3), 1, %s628_s16  }
  0x1a   : > { %198 = sbr.rel (%p195_p3) target bundleno = 690 (0x2b2), region = 36  ;;  %s451_s22 = sshll.u32 (!%p195_p3), %s746_s21, 3 }
  0x1b   : > { %s201_s24 = scalar_lea.sflag (!%p195_p3), [#allocation3], %s746_s21  ;;  %s204_s26 = scalar_lea.vmem (!%p195_p3), [#allocation2], %s451_s22 }
  0x1f   : > { %615 = dma.done.wait (%p719_p8), %s201_s24, 128  }
  0x20   : > { %617 = vsyncadd (%p719_p8), %s201_s24, 4294967168  ;;  %s754_s25 = scalar_lea.vmem [#allocation5], %s451_s22  ;;  %v646_v0 = vmov 0.0   ;;  %vm248_vm0 = vcmask 1043456   ;;  %v239_v1 = vld [vmem:[%s827_s1 + $0x10] sm:$0xf] }
  0x21   : > { %235 = vst [vmem:[%s754_s25] sm:$0xff] %v646_v0  ;;  %v238_v2 = vld [vmem:[%s827_s1 + $0x8] sm:$0xff]  ;;  %453 = vmatpush.msk.msra.mxu0 %vm248_vm0, %v239_v1  ;;  %v237_v3 = vld [vmem:[%s827_s1] sm:$0xff]  ;;  %vm244_vm1 = vcmask 162816   ;;  %v275_v5 = vld [vmem:[%s829_s3 + $0x10] sm:$0xf]  ;;  %s779_s5 = sshll.u32 %s636_s18, 3 }
  0x22   : > { %v236_v4 = vld [vmem:[%s204_s26] sm:$0xff]  ;;  %455 = vmatpush.msk.msra.mxu1 %vm248_vm0, %v275_v5  ;;  %s304_s6 = sadd.s32 8, %s779_s5 }
  0x23   : > { %266 = vmatpush.msra.mxu0 %v238_v2  ;;  %v274_v6 = vld [vmem:[%s829_s3 + $0x8] sm:$0xff]  ;;  %v273_v7 = vld [vmem:[%s829_s3] sm:$0xff]  ;;  %p458_p4 = scmp.le.s32.totalorder %s304_s6, 2 }
  0x24   : > { %296 = vmatpush.msra.mxu1 %v274_v6  ;;  %v531_v8 = vld [vmem:[%s828_s2] ss:$0 sm:$0xff] }
  0x25   : > { %267 = vmatpush.msra.mxu0 %v237_v3 }
  0x26   : > { %454 = vmatmul.msk.f32.vlgmr.msra.gmra.mxu0 %vm244_vm1, %v236_v4  ;;  %297 = vmatpush.msra.mxu1 %v273_v7 }
  0xa3   : > { %v269_v9 = vpop.f32.mrf.mxu0 }
  0xa4   : > { %v270_v10 = vadd.f32 %v531_v8, %v269_v9 }
  0xa6   : > { %v272_v11 = vmax.f32 %v270_v10, 0.0 }
  0xa8   : > { %456 = vmatmul.msk.f32.vlgmr.msra.gmra.mxu1 %vm244_vm1, %v272_v11 }
 0x121   : > { %308 = sbr.rel (%p458_p4) target bundleno = 485 (0x1e5), region = 48 }
 0x125   : > { %v299_v12 = vpop.f32.mrf.mxu1 }
 0x126   : > { %v309_v13 = vlaneseq  ;;  %v311_v14 = vstv %s779_s5  ;;  %vm316_vm2 = vcmask 7168   ;;  %v315_v26 = vld [vmem:[%s754_s25] sm:$0xff] }
 0x128   : > { %v310_v15 = vshrl.u32 %v309_v13, 7 }
 0x12a   : > { %v312_v16 = vadd.s32 %v311_v14, %v310_v15 }
 0x12c   : > { %vm313_vm3 = vcmp.lt.s32.totalorder %v312_v16, 2 }
 0x12d   : > { %v314_v17 = vsel %vm313_vm3, %v299_v12, 0.0 }
 0x12e   : > { %v317_v18 = vsel %vm316_vm2, %v314_v17, 0.0 }
 0x12f   : > { %318 = vadd.xlane.f32.xlu0 %v317_v18 }
 0x1a2   : > { %v319_v19 = vpop.xlane.xlu0 %318 }
 0x1a3   : > { %v320_v20 = vrot.slane %v319_v19, 4 }
 0x1a5   : > { %v321_v21 = vadd.f32 %v320_v20, %v319_v19 }
 0x1a7   : > { %v322_v22 = vrot.slane %v321_v21, 2 }
 0x1a9   : > { %v323_v23 = vadd.f32 %v322_v22, %v321_v21 }
 0x1ab   : > { %v324_v24 = vrot.slane %v323_v23, 1 }
 0x1ad   : > { %v325_v25 = vadd.f32 %v324_v24, %v323_v23 }
 0x1af   : > { %464 = vpush %v325_v25 }
 0x1e0   : > { %s465_s18 = spop %464 }
 0x1e1   : > { %v327_v27 = vstv %s465_s18 }
 0x1e2   : > { %v328_v28 = vadd.f32 %v327_v27, %v315_v26 }
 0x1e4   : > { %329 = vst [vmem:[%s754_s25] sm:$0xff] %v328_v28 }
 0x1e5 PF: > { %p459_p5 = scmp.gt.s32.totalorder %s304_s6, 2 }
 0x1e7   : > { %333 = sbr.rel (%p459_p5) target bundleno = 676 (0x2a4), region = 52 }
 0x1ec   : > { %vm335_vm4 = vcmask 7168   ;;  %v334_v37 = vld [vmem:[%s754_s25] sm:$0xff] }
 0x1ed   : > { %v336_v29 = vsel %vm335_vm4, %v299_v12, 0.0 }
 0x1ee   : > { %337 = vadd.xlane.f32.xlu0 %v336_v29 }
 0x261   : > { %v338_v30 = vpop.xlane.xlu0 %337 }
 0x262   : > { %v339_v31 = vrot.slane %v338_v30, 4 }
 0x264   : > { %v340_v32 = vadd.f32 %v339_v31, %v338_v30 }
 0x266   : > { %v341_v33 = vrot.slane %v340_v32, 2 }
 0x268   : > { %v342_v34 = vadd.f32 %v341_v33, %v340_v32 }
 0x26a   : > { %v343_v35 = vrot.slane %v342_v34, 1 }
 0x26c   : > { %v344_v36 = vadd.f32 %v343_v35, %v342_v34 }
 0x26e   : > { %466 = vpush %v344_v36 }
 0x29f   : > { %s467_s7 = spop %466 }
 0x2a0   : > { %v346_v38 = vstv %s467_s7 }
 0x2a1   : > { %v347_v39 = vadd.f32 %v346_v38, %v334_v37 }
 0x2a3   : > { %348 = vst [vmem:[%s754_s25] sm:$0xff] %v347_v39 }
 0x2a4 PF: > { %s360_s10 = scalar_lea.hbm %s830_s4, %s779_s5  ;;  %s362_s27 = sshll.u32 %s754_s25, 4  ;;  %s363_s27 = int_to_ptr.vmem [resolvable:$true] %s362_s27 }
 0x2a5   : > { %s364_s11 = sshll.u32 %s360_s10, 4  ;;  %s350_s12 = scalar_lea.sflag [#allocation4], %s746_s21  ;;  %s365_s11 = int_to_ptr.hbm [resolvable:$true] %s364_s11 }
 0x2a6   : > { %s576_s13 = sshra.s32 %s365_s11, 4  ;;  %s582_s26 = scalar_lea.hbm %s830_s4, 16  ;;  %s577_s13 = int_to_ptr.hbm [resolvable:$true] %s576_s13 }
 0x2a7   : > { %s578_s14 = scalar_lea.hbm %s577_s13, 8  ;;  %p583_p10 = scmp.lt.s32.totalorder %s577_s13, %s830_s4 }
 0x2a8   : > { %p579_p6 = scmp.ne.s32.totalorder %s577_s13, %s578_s14  ;;  %p584_p13 = scmp.lt.s32.totalorder %s582_s26, %s578_s14 }
 0x2aa   : > { %p580_p7 = pnand %p579_p6, %p723_p9  ;;  %p585_p0 = por %p584_p13, %p583_p10 }
 0x2ac   : > { %p581_p8 = pneg %p580_p7 }
 0x2ae   : > { %p586_p1 = pnand %p585_p0, %p581_p8 }
 0x2b0   : > { %589 = shalt.err (!%p586_p1)
}
 0x2b1   : > { %470 = dma.vmem_to_hbm [thread:$0]  (%p723_p9), %s363_s27, 128, %s365_s11, %s350_s12  }
 0x2b2 PF: > { %s376_s21 = sand.u32 1, %s624_s15   ;;  %p477_p2 = pnand %p447_p12, %p730_p11 }
 0x2b3   : > { %s377_s25 = scalar_lea.sflag [#allocation4], %s376_s21 }
 0x2b4   : > { %p478_p3 = pneg %p477_p2 }
 0x2b6   : > { %619 = dma.done.wait (%p478_p3), %s377_s25, 128  }
 0x2b7   : > { %621 = vsyncadd (%p478_p3), %s377_s25, 4294967168  ;;  %s20_s20 = sadd.s32 1, %s644_s20   ;;  %s835_s15 = smov %s628_s16 }
 0x2b8   : > { %p17_p4 = scmp.ge.s32.totalorder %s20_s20, 4   ;;  %s836_s16 = smov %s632_s17 }
 0x2b9   : > { %s837_s17 = smov %s728_s29  ;;  %s838_s18 = smov %s640_s19 }
 0x2ba   : > { %s839_s19 = smov %s841_s23  ;;  %19 = sbr.rel (!%p17_p4) target bundleno = 6 (0x6), region = 93 }
 0x2bf   :  { %383 = vsyncpa [#allocation3], 1 }
 0x2c0   :  { %385 = vsyncpa [#allocation3 + $0x1], 1 }
 0x2c1   :  { %386 = vsyncpa [#allocation4], 1 }
 0x2c2   :  { %388 = vsyncpa [#allocation4 + $0x1], 1 }

</bundles_post_ra>
